<compile_context>
chip_gen: v5e
topology: v5e:2x2
jax: 0.10.0
libtpu: 0.0.40
codegen_flags: <defaults>
</compile_context>

<pallas_src>
import functools

import jax
import jax.numpy as jnp
from jax import lax
from jax.experimental import pallas as pl
from jax.experimental.pallas import tpu as pltpu

LANES = 128                 # vreg lane width
SUBLANES = 8                # vreg sublane count (f32)
DEFAULT_BLOCK_ROWS = 2048   # 2048 * 128 * 4 B = 1 MiB per f32 input tile

# Static upper bound on integer labels in weight_map.  The PyTorch loop bound
# max(weight_map) is data dependent; the kernel accumulates stats for labels
# 1..MAX_LABELS and the on-device epilogue masks out labels > max(weight_map).
# TODO(synk): labels > MAX_LABELS are silently dropped; raise MAX_LABELS (or add
# an in-kernel overflow counter + pl.debug_check) if the dataset uses more
# region labels.
MAX_LABELS = 8


# ---------------------------------------------------------------------------
# helpers: lane-dense packing of an arbitrary array into (rows, 128)
# ---------------------------------------------------------------------------
def _round_up(x, m):
    return ((x + m - 1) // m) * m


def _to_lane_dense(x, pad_value):
    """Flatten x and reshape to (rows, 128); pad only to 8-row granularity."""
    flat = x.reshape(-1)
    total = flat.shape[0]
    rows = _round_up(max(1, (total + LANES - 1) // LANES), SUBLANES)
    padded_total = rows * LANES
    if padded_total != total:
        flat = jnp.pad(flat, (0, padded_total - total), constant_values=pad_value)
    return flat.reshape(rows, LANES)


def _pick_block_rows(rows, block_rows):
    if block_rows is None:
        block_rows = DEFAULT_BLOCK_ROWS
    return max(SUBLANES, min(_round_up(block_rows, SUBLANES), rows))


def _row_valid_mask(block_rows, tail_rows):
    """True for rows of the current block that are inside the padded array."""
    is_last = pl.program_id(0) == pl.num_programs(0) - 1
    row = lax.broadcasted_iota(jnp.int32, (block_rows, LANES), 0)
    return jnp.logical_or(jnp.logical_not(is_last), row < tail_rows)


# ---------------------------------------------------------------------------
# Kernel 1: plain masked MSE (mask = gt > 0)
#   per step : where-selects + sublane-block tree reduce  ->  (8,128) RMW x2
#   epilogue : copy the two (8,128) accumulators to lane-dense outputs
# ---------------------------------------------------------------------------
def _masked_mse_kernel(pred_ref, gt_ref, sum_ref, cnt_ref, acc_sum, acc_cnt,
                       *, block_rows, tail_rows):
    i = pl.program_id(0)

    @pl.when(i == 0)
    def _init():
        acc_sum[...] = jnp.zeros_like(acc_sum)
        acc_cnt[...] = jnp.zeros_like(acc_cnt)

    pred = pred_ref[...].astype(jnp.float32)
    gt = gt_ref[...].astype(jnp.float32)
    err = pred - gt
    mask = gt > 0                                   # padding (gt == 0) excluded
    if tail_rows is not None:                       # partial last block (static)
        mask = jnp.logical_and(mask, _row_valid_mask(block_rows, tail_rows))

    err2 = jnp.where(mask, err * err, 0.0)
    ones = jnp.where(mask, 1.0, 0.0)
    # sublane-block tree reduction: (block_rows,128) -> (8,128), pure VALU.
    acc_sum[...] += jnp.sum(err2.reshape(-1, SUBLANES, LANES), axis=0)
    acc_cnt[...] += jnp.sum(ones.reshape(-1, SUBLANES, LANES), axis=0)

    @pl.when(i == pl.num_programs(0) - 1)
    def _finalize():
        sum_ref[...] = acc_sum[...]
        cnt_ref[...] = acc_cnt[...]


@functools.partial(jax.jit, static_argnames=("block_rows",))
def masked_mse(prediction, gt, block_rows=None):
    pred0 = prediction[:, 0]                        # (N, H, W), channel 0
    p2 = _to_lane_dense(pred0, 0)
    g2 = _to_lane_dense(gt, 0)
    rows = p2.shape[0]
    block_rows = _pick_block_rows(rows, block_rows)
    nb = pl.cdiv(rows, block_rows)
    rem = rows % block_rows
    tail_rows = rem if rem else None

    kernel = functools.partial(_masked_mse_kernel,
                               block_rows=block_rows, tail_rows=tail_rows)
    in_spec = pl.BlockSpec((block_rows, LANES), lambda i: (i, 0))
    out_spec = pl.BlockSpec((SUBLANES, LANES), lambda i: (0, 0))
    sum_out, cnt_out = pl.pallas_call(
        kernel,
        out_shape=(jax.ShapeDtypeStruct((SUBLANES, LANES), jnp.float32),
                   jax.ShapeDtypeStruct((SUBLANES, LANES), jnp.float32)),
        grid=(nb,),
        in_specs=[in_spec, in_spec],
        out_specs=(out_spec, out_spec),
        scratch_shapes=[pltpu.VMEM((SUBLANES, LANES), jnp.float32),
                        pltpu.VMEM((SUBLANES, LANES), jnp.float32)],
        compiler_params=pltpu.CompilerParams(dimension_semantics=("arbitrary",)),
    )(p2, g2)

    # tiny on-device combine (no host sync, jittable)
    return jnp.sum(sum_out) / jnp.sum(cnt_out)


# ---------------------------------------------------------------------------
# Kernel 2: per-label sums / counts for the weighted-MSE branch.
#   per step : 1 int compare + 2 selects + tree-reduce per label, then a
#              single (8,128) accumulator RMW per label per quantity.
# ---------------------------------------------------------------------------
def _weighted_stats_kernel(pred_ref, gt_ref, wmap_ref, sums_ref, cnts_ref,
                           acc_sum, acc_cnt, *, block_rows, tail_rows):
    i = pl.program_id(0)

    @pl.when(i == 0)
    def _init():
        acc_sum[...] = jnp.zeros_like(acc_sum)
        acc_cnt[...] = jnp.zeros_like(acc_cnt)

    pred = pred_ref[...].astype(jnp.float32)
    gt = gt_ref[...].astype(jnp.float32)
    err = pred - gt
    err2 = err * err
    wmap = wmap_ref[...]                            # integer labels end-to-end
    if tail_rows is not None:                       # partial last block (static)
        # label 0 never matches, so forcing invalid rows to 0 makes them inert.
        wmap = jnp.where(_row_valid_mask(block_rows, tail_rows), wmap, 0)

    for l in range(MAX_LABELS):                     # static unrolled, pure VPU
        m = wmap == (l + 1)                         # one compare, reused twice
        acc_sum[l] += jnp.sum(jnp.where(m, err2, 0.0).reshape(-1, SUBLANES, LANES),
                              axis=0)
        acc_cnt[l] += jnp.sum(jnp.where(m, 1.0, 0.0).reshape(-1, SUBLANES, LANES),
                              axis=0)

    @pl.when(i == pl.num_programs(0) - 1)
    def _finalize():
        sums_ref[...] = acc_sum[...]
        cnts_ref[...] = acc_cnt[...]


@functools.partial(jax.jit, static_argnames=("block_rows",))
def weighted_mse(prediction, gt, weight_map, block_rows=None):
    pred0 = prediction[:, 0]
    p2 = _to_lane_dense(pred0, 0)
    g2 = _to_lane_dense(gt, 0)
    w2 = _to_lane_dense(weight_map, 0)              # stays integer (no cast pass)
    rows = p2.shape[0]
    block_rows = _pick_block_rows(rows, block_rows)
    nb = pl.cdiv(rows, block_rows)
    rem = rows % block_rows
    tail_rows = rem if rem else None

    kernel = functools.partial(_weighted_stats_kernel,
                               block_rows=block_rows, tail_rows=tail_rows)
    in_spec = pl.BlockSpec((block_rows, LANES), lambda i: (i, 0))
    out_spec = pl.BlockSpec((MAX_LABELS, SUBLANES, LANES), lambda i: (0, 0, 0))
    sums_out, cnts_out = pl.pallas_call(
        kernel,
        out_shape=(jax.ShapeDtypeStruct((MAX_LABELS, SUBLANES, LANES), jnp.float32),
                   jax.ShapeDtypeStruct((MAX_LABELS, SUBLANES, LANES), jnp.float32)),
        grid=(nb,),
        in_specs=[in_spec, in_spec, in_spec],
        out_specs=(out_spec, out_spec),
        scratch_shapes=[pltpu.VMEM((MAX_LABELS, SUBLANES, LANES), jnp.float32),
                        pltpu.VMEM((MAX_LABELS, SUBLANES, LANES), jnp.float32)],
        compiler_params=pltpu.CompilerParams(dimension_semantics=("arbitrary",)),
    )(p2, g2, w2)

    # Combine and emulate the data-dependent PyTorch loop on device:
    # max_val = largest label with a non-zero pixel count.
    sums = jnp.sum(sums_out, axis=(1, 2))           # (MAX_LABELS,)
    cnts = jnp.sum(cnts_out, axis=(1, 2))           # (MAX_LABELS,)
    labels = jnp.arange(1, MAX_LABELS + 1, dtype=jnp.float32)
    max_val = jnp.max(jnp.where(cnts > 0, labels, 0.0))
    per_label = sums / cnts                         # NaN for empty labels (matches torch)
    loss = jnp.sum(jnp.where(labels <= max_val, per_label, 0.0))
    return loss / max_val                           # NaN if no foreground (matches torch)


# ---------------------------------------------------------------------------
# Module-equivalent wrapper
# ---------------------------------------------------------------------------
class MSELossPallas:
    def __init__(self, mask_intersec):
        self.weighted_mse = mask_intersec

    def __call__(self, prediction, gt, weight_map, epoch=0):
        if self.weighted_mse:
            return weighted_mse(prediction, gt, weight_map)
        return masked_mse(prediction, gt)


# ---------------------------------------------------------------------------
# Pure-JAX references (for correctness check only)
# ---------------------------------------------------------------------------
def _ref_masked(prediction, gt):
    err = prediction[:, 0:1] - gt
    mask = gt > 0
    return jnp.sum(jnp.where(mask, err * err, 0.0)) / jnp.sum(mask)


def _ref_weighted(prediction, gt, weight_map):
    err = prediction[:, 0:1] - gt
    max_val = int(jnp.max(weight_map))
    loss = jnp.float32(0.0)
    for i in range(1, max_val + 1):
        m = weight_map == i
        loss = loss + jnp.sum(jnp.where(m, err * err, 0.0)) / jnp.sum(m)
    return loss / max_val


if __name__ == "__main__":
    key = jax.random.PRNGKey(0)
    k1, k2, k3 = jax.random.split(key, 3)

    # --- small case, single grid step --------------------------------------
    N, C, H, W = 2, 4, 16, 16
    prediction = jax.random.normal(k1, (N, C, H, W), dtype=jnp.float32)
    gt = jax.random.uniform(k2, (N, 1, H, W), dtype=jnp.float32) - 0.3
    weight_map = jax.random.randint(k3, (N, 1, H, W), 0, 5).astype(jnp.int32)

    loss_plain = MSELossPallas(mask_intersec=False)(prediction, gt, weight_map)
    loss_weighted = MSELossPallas(mask_intersec=True)(prediction, gt, weight_map)
    loss_plain, loss_weighted = jax.block_until_ready((loss_plain, loss_weighted))

    ref_plain = _ref_masked(prediction, gt)
    ref_weighted = _ref_weighted(prediction, gt, weight_map)
    assert jnp.isfinite(loss_plain) and jnp.isfinite(loss_weighted)
    assert jnp.allclose(loss_plain, ref_plain, rtol=1e-4, atol=1e-5), (loss_plain, ref_plain)
    assert jnp.allclose(loss_weighted, ref_weighted, rtol=1e-4, atol=1e-5), (loss_weighted, ref_weighted)

    # --- multi-step grid with a partial last block (forced small blocks) ---
    N2, H2, W2 = 2, 44, 52                           # 4576 elems -> 40 rows
    p_big = jax.random.normal(k1, (N2, C, H2, W2), dtype=jnp.float32)
    g_big = jax.random.uniform(k2, (N2, 1, H2, W2), dtype=jnp.float32) - 0.3
    w_big = jax.random.randint(k3, (N2, 1, H2, W2), 0, 6).astype(jnp.int32)
    lp = masked_mse(p_big, g_big, block_rows=16)     # 40 % 16 != 0 -> partial block
    lw = weighted_mse(p_big, g_big, w_big, block_rows=16)
    lp, lw = jax.block_until_ready((lp, lw))
    assert jnp.allclose(lp, _ref_masked(p_big, g_big), rtol=1e-4, atol=1e-5)
    assert jnp.allclose(lw, _ref_weighted(p_big, g_big, w_big), rtol=1e-4, atol=1e-5)

    print("KERNEL_OK")
</pallas_src>

<mosaic_0001>
module attributes {stable_mosaic.version = 11 : i64} {
  func.func @_masked_mse_kernel(%arg0: i32, %arg1: memref<8x128xf32, #tpu.memory_space<vmem>>, %arg2: memref<8x128xf32, #tpu.memory_space<vmem>>, %arg3: memref<8x128xf32, #tpu.memory_space<vmem>>, %arg4: memref<8x128xf32, #tpu.memory_space<vmem>>, %arg5: memref<8x128xf32, #tpu.memory_space<vmem>>, %arg6: memref<8x128xf32, #tpu.memory_space<vmem>>) attributes {dimension_semantics = [#tpu.dimension_semantics<arbitrary>], iteration_bounds = array<i64: 1>, scalar_prefetch = 0 : i64, scratch_operands = 2 : i64, tpu.core_type = #tpu.core_type<tc>, window_params = [{transform_indices = @transform_0, window_bounds = array<i64: 8, 128>}, {transform_indices = @transform_1, window_bounds = array<i64: 8, 128>}, {pipeline_mode = #tpu.pipeline_mode<synchronous>, transform_indices = @transform_2, window_bounds = array<i64: 8, 128>}, {pipeline_mode = #tpu.pipeline_mode<synchronous>, transform_indices = @transform_3, window_bounds = array<i64: 8, 128>}]} {
    %c0_i32 = arith.constant 0 : i32
    %0 = arith.cmpi eq, %arg0, %c0_i32 : i32
    %1 = arith.extui %0 : i1 to i32
    %c0_i32_0 = arith.constant 0 : i32
    %2 = arith.cmpi ne, %1, %c0_i32_0 : i32
    scf.if %2 {
      %cst_19 = arith.constant 0.000000e+00 : f32
      %27 = vector.broadcast %cst_19 : f32 to vector<8x128xf32>
      %c0_20 = arith.constant 0 : index
      %c0_21 = arith.constant 0 : index
      %28 = vector.load %arg5[%c0_20, %c0_21] : memref<8x128xf32, #tpu.memory_space<vmem>>, vector<8x128xf32>
      tpu.vector_store %arg5[%c0_20, %c0_21], %27 {strides = array<i32>} : memref<8x128xf32, #tpu.memory_space<vmem>>, vector<8x128xf32>,
      %cst_22 = arith.constant 0.000000e+00 : f32
      %29 = vector.broadcast %cst_22 : f32 to vector<8x128xf32>
      %c0_23 = arith.constant 0 : index
      %c0_24 = arith.constant 0 : index
      %30 = vector.load %arg6[%c0_23, %c0_24] : memref<8x128xf32, #tpu.memory_space<vmem>>, vector<8x128xf32>
      tpu.vector_store %arg6[%c0_23, %c0_24], %29 {strides = array<i32>} : memref<8x128xf32, #tpu.memory_space<vmem>>, vector<8x128xf32>,
    } else {
    }
    %c0 = arith.constant 0 : index
    %c0_1 = arith.constant 0 : index
    %3 = vector.load %arg1[%c0, %c0_1] : memref<8x128xf32, #tpu.memory_space<vmem>>, vector<8x128xf32>
    %c0_2 = arith.constant 0 : index
    %c0_3 = arith.constant 0 : index
    %4 = vector.load %arg2[%c0_2, %c0_3] : memref<8x128xf32, #tpu.memory_space<vmem>>, vector<8x128xf32>
    %5 = arith.subf %3, %4 : vector<8x128xf32>
    %cst = arith.constant 0.000000e+00 : f32
    %6 = vector.broadcast %cst : f32 to vector<8x128xf32>
    %7 = arith.cmpf ogt, %4, %6 : vector<8x128xf32>
    %8 = arith.mulf %5, %5 : vector<8x128xf32>
    %cst_4 = arith.constant 0.000000e+00 : f32
    %9 = vector.broadcast %cst_4 : f32 to vector<8x128xf32>
    %10 = arith.select %7, %8, %9 : vector<8x128xi1>, vector<8x128xf32>
    %cst_5 = arith.constant 1.000000e+00 : f32
    %cst_6 = arith.constant 0.000000e+00 : f32
    %11 = vector.broadcast %cst_5 : f32 to vector<8x128xf32>
    %12 = vector.broadcast %cst_6 : f32 to vector<8x128xf32>
    %13 = arith.select %7, %11, %12 : vector<8x128xi1>, vector<8x128xf32>
    %c0_7 = arith.constant 0 : index
    %c0_8 = arith.constant 0 : index
    %14 = vector.load %arg5[%c0_7, %c0_8] : memref<8x128xf32, #tpu.memory_space<vmem>>, vector<8x128xf32>
    %15 = vector.shape_cast %10 : vector<8x128xf32> to vector<1x8x128xf32>
    %cst_9 = arith.constant dense<0.000000e+00> : vector<8x128xf32>
    %16 = vector.multi_reduction <add>, %15, %cst_9 [0] : vector<1x8x128xf32> to vector<8x128xf32>
    %17 = arith.addf %14, %16 : vector<8x128xf32>
    %c0_10 = arith.constant 0 : index
    %c0_11 = arith.constant 0 : index
    %18 = vector.load %arg5[%c0_10, %c0_11] : memref<8x128xf32, #tpu.memory_space<vmem>>, vector<8x128xf32>
    tpu.vector_store %arg5[%c0_10, %c0_11], %17 {strides = array<i32>} : memref<8x128xf32, #tpu.memory_space<vmem>>, vector<8x128xf32>,
    %c0_12 = arith.constant 0 : index
    %c0_13 = arith.constant 0 : index
    %19 = vector.load %arg6[%c0_12, %c0_13] : memref<8x128xf32, #tpu.memory_space<vmem>>, vector<8x128xf32>
    %20 = vector.shape_cast %13 : vector<8x128xf32> to vector<1x8x128xf32>
    %cst_14 = arith.constant dense<0.000000e+00> : vector<8x128xf32>
    %21 = vector.multi_reduction <add>, %20, %cst_14 [0] : vector<1x8x128xf32> to vector<8x128xf32>
    %22 = arith.addf %19, %21 : vector<8x128xf32>
    %c0_15 = arith.constant 0 : index
    %c0_16 = arith.constant 0 : index
    %23 = vector.load %arg6[%c0_15, %c0_16] : memref<8x128xf32, #tpu.memory_space<vmem>>, vector<8x128xf32>
    tpu.vector_store %arg6[%c0_15, %c0_16], %22 {strides = array<i32>} : memref<8x128xf32, #tpu.memory_space<vmem>>, vector<8x128xf32>,
    %c0_i32_17 = arith.constant 0 : i32
    %24 = arith.cmpi eq, %arg0, %c0_i32_17 : i32
    %25 = arith.extui %24 : i1 to i32
    %c0_i32_18 = arith.constant 0 : i32
    %26 = arith.cmpi ne, %25, %c0_i32_18 : i32
    scf.if %26 {
      %c0_19 = arith.constant 0 : index
      %c0_20 = arith.constant 0 : index
      %27 = vector.load %arg5[%c0_19, %c0_20] : memref<8x128xf32, #tpu.memory_space<vmem>>, vector<8x128xf32>
      %c0_21 = arith.constant 0 : index
      %c0_22 = arith.constant 0 : index
      %28 = vector.load %arg3[%c0_21, %c0_22] : memref<8x128xf32, #tpu.memory_space<vmem>>, vector<8x128xf32>
      tpu.vector_store %arg3[%c0_21, %c0_22], %27 {strides = array<i32>} : memref<8x128xf32, #tpu.memory_space<vmem>>, vector<8x128xf32>,
      %c0_23 = arith.constant 0 : index
      %c0_24 = arith.constant 0 : index
      %29 = vector.load %arg6[%c0_23, %c0_24] : memref<8x128xf32, #tpu.memory_space<vmem>>, vector<8x128xf32>
      %c0_25 = arith.constant 0 : index
      %c0_26 = arith.constant 0 : index
      %30 = vector.load %arg4[%c0_25, %c0_26] : memref<8x128xf32, #tpu.memory_space<vmem>>, vector<8x128xf32>
      tpu.vector_store %arg4[%c0_25, %c0_26], %29 {strides = array<i32>} : memref<8x128xf32, #tpu.memory_space<vmem>>, vector<8x128xf32>,
    } else {
    }
    return
  }
  func.func @transform_0(%arg0: i32) -> (i32, i32) {
    %c0_i32 = arith.constant 0 : i32
    %c0_i32_0 = arith.constant 0 : i32
    return %arg0, %c0_i32 : i32, i32
  }
  func.func @transform_1(%arg0: i32) -> (i32, i32) {
    %c0_i32 = arith.constant 0 : i32
    %c0_i32_0 = arith.constant 0 : i32
    return %arg0, %c0_i32 : i32, i32
  }
  func.func @transform_2(%arg0: i32) -> (i32, i32) {
    %c0_i32 = arith.constant 0 : i32
    %c0_i32_0 = arith.constant 0 : i32
    %c0_i32_1 = arith.constant 0 : i32
    return %c0_i32, %c0_i32_0 : i32, i32
  }
  func.func @transform_3(%arg0: i32) -> (i32, i32) {
    %c0_i32 = arith.constant 0 : i32
    %c0_i32_0 = arith.constant 0 : i32
    %c0_i32_1 = arith.constant 0 : i32
    return %c0_i32, %c0_i32_0 : i32, i32
  }
}

</mosaic_0001>

<bundles_post_ra>
// kernel: squeeze.1
= control target key start
LH: loop header
LB: loop body
LE: loop exit
PB: predicated region body
PF: predicated region fallthrough
CT: control target
= control target key end

     0   :  { %s67_s8 = smov 112   ;;  %s68_s11 = smov 80   ;;  %vm3_vm0 = vcmask 130048   ;;  %vm9_vm1 = vcmask 1048448   ;;  %vm15_vm2 = vcmask 917248   ;;  %vm21_vm3 = vcmask 786048   ;;  %s111_s0 = inlined_call_operand.vmem [shape: f32[2,1,16,16], index: 0, kind: input, shape index: {}]   ;;  %s112_s1 = inlined_call_operand.vmem [shape: f32[512], index: 1, kind: output, shape index: {}]  }
   0x1   :  { %v53_v0 = vld [vmem:[%s111_s0 + $0x7] ss:$8 sm:$0xf]   ;;  %v55_v1 = vld [vmem:[%s111_s0 + $0x5] ss:$8 sm:$0xf]  }
   0x2   :  { %7 = vrot.lane.b32.xlu0 %v53_v0, %s67_s8  ;;  %19 = vrot.lane.b32.xlu1 %v55_v1, %s68_s11  ;;  %v57_v2 = vld [vmem:[%s111_s0 + $0x3] ss:$8 sm:$0xf]   ;;  %s69_s14 = smov 48   ;;  %s70_s19 = smov 96   ;;  %vm27_vm4 = vcmask 654848  }
   0x3   :  { %31 = vrot.lane.b32.xlu2 %v57_v2, %s69_s14  ;;  %v54_v3 = vld [vmem:[%s111_s0 + $0x6] ss:$8 sm:$0xf]   ;;  %v56_v4 = vld [vmem:[%s111_s0 + $0x4] ss:$8 sm:$0xf]  }
   0x4   :  { %s71_s20 = smov 64   ;;  %v58_v5 = vld [vmem:[%s111_s0 + $0x2] ss:$8 sm:$0xf]   ;;  %s72_s23 = smov 32   ;;  %vm33_vm5 = vcmask 523648  }
   0x5   :  { %v59_v6 = vld [vmem:[%s111_s0 + $0x1] ss:$8 sm:$0xf]   ;;  %s73_s26 = smov 16   ;;  %vm39_vm6 = vcmask 392448   ;;  %vm45_vm7 = vcmask 261248  }
   0x6   :  { %v2_v7 = vld [vmem:[%s111_s0] ss:$8 sm:$0xf]  }
   0x7   :  { %4 = vst.msk [vmem:[#allocation0] sm:$0xf] %vm3_vm0, %v2_v7  }
   0xa   :  { %13 = vrot.lane.b32.xlu0 %v54_v3, %s70_s19  ;;  %25 = vrot.lane.b32.xlu1 %v56_v4, %s71_s20 }
   0xb   :  { %37 = vrot.lane.b32.xlu2 %v58_v5, %s72_s23 }
  0x12   :  { %43 = vrot.lane.b32.xlu0 %v59_v6, %s73_s26 }
  0x5d   :  { %v32_v8 = vpop.permute.xlu2 %31  }
  0x65   :  { %v38_v9 = vpop.permute.xlu2 %37  }
  0x74   :  { %v8_v10 = vpop.permute.xlu0 %7   ;;  %v20_v11 = vpop.permute.xlu1 %19  }
  0x75   :  { %10 = vst.msk [vmem:[#allocation0] sm:$0xf] %vm9_vm1, %v8_v10  }
  0x7c   :  { %v14_v12 = vpop.permute.xlu0 %13   ;;  %v26_v13 = vpop.permute.xlu1 %25  }
  0x7d   :  { %16 = vst.msk [vmem:[#allocation0] sm:$0xf] %vm15_vm2, %v14_v12  }
  0x7e   :  { %22 = vst.msk [vmem:[#allocation0] sm:$0xf] %vm21_vm3, %v20_v11  }
  0x7f   :  { %28 = vst.msk [vmem:[#allocation0] sm:$0xf] %vm27_vm4, %v26_v13  }
  0x80   :  { %34 = vst.msk [vmem:[#allocation0] sm:$0xf] %vm33_vm5, %v32_v8  }
  0x81   :  { %40 = vst.msk [vmem:[#allocation0] sm:$0xf] %vm39_vm6, %v38_v9  }
  0x84   :  { %v44_v14 = vpop.permute.xlu0 %43  }
  0x85   :  { %46 = vst.msk [vmem:[#allocation0] sm:$0xf] %vm45_vm7, %v44_v14  }
  0x8c   :  { %v49_v15 = vld [vmem:[#allocation0] sm:$0xf] }
  0x8d   :  { %52 = vst [vmem:[%s112_s1] sm:$0xf] %v49_v15 }

// kernel: masked_mse.1
= control target key start
LH: loop header
LB: loop body
LE: loop exit
PB: predicated region body
PF: predicated region fallthrough
CT: control target
= control target key end

     0   :  { %v50_v3 = vmov 0.0   ;;  %s83_s0 = inlined_call_operand.vmem [shape: f32[8,128], index: 0, kind: input, shape index: {}]   ;;  %s84_s1 = inlined_call_operand.vmem [shape: f32[8,128], index: 1, kind: input, shape index: {}]   ;;  %s85_s3 = inlined_call_operand.vmem [shape: f32[8,128], index: 3, kind: output, shape index: {1}]   ;;  %s86_s2 = inlined_call_operand.vmem [shape: f32[8,128], index: 2, kind: output, shape index: {0}]  }
   0x1   :  { %v19_v0 = vld [vmem:[%s83_s0] sm:$0xff] }
   0x2   :  { %v20_v1 = vld [vmem:[%s84_s1] sm:$0xff] }
   0x3   :  { %v21_v2 = vsub.f32 %v19_v0, %v20_v1  ;;  %vm22_vm0 = vcmp.gt.f32.partialorder %v20_v1, 0.0 }
   0x4   :  { %v25_v4 = vsel %vm22_vm0, 1.0, %v50_v3 }
   0x5   :  { %v23_v5 = vmul.f32 %v21_v2, %v21_v2  ;;  %40 = vst [vmem:[%s85_s3] sm:$0xff] %v25_v4 }
   0x7   :  { %v24_v6 = vsel %vm22_vm0, %v23_v5, 0.0 }
   0x8   :  { %38 = vst [vmem:[%s86_s2] sm:$0xff] %v24_v6 }

</bundles_post_ra>
